<compile_context>
chip_gen: v6e
topology: v6e:2x2x1
jax: 0.10.0
libtpu: 0.0.40
codegen_flags: <defaults>
</compile_context>

<pallas_src>
import jax
import jax.numpy as jnp
from jax.experimental import pallas as pl
from jax.experimental.pallas import tpu as pltpu


def _round_up(x, m):
    return ((x + m - 1) // m) * m


def edge_mapping_kernel(w_ref, x_ref, o_ref):
    """w_ref: VMEM (C, 1) f32; x_ref: VMEM (D, TN); o_ref: VMEM (D, C, TN)."""
    x = x_ref[...].astype(jnp.float32)                       # (D, TN), N on lanes
    w = w_ref[...]                                            # (C, 1) f32
    d_dim = x.shape[0]

    # Sum of squares over the tiny static D axis, unrolled -> a few VPU mul/adds
    # (no XLU cross-sublane reduce).
    sumsq = x[0:1, :] * x[0:1, :]
    for d in range(1, d_dim):
        sumsq = sumsq + x[d:d + 1, :] * x[d:d + 1, :]         # (1, TN)

    # Exact normalization to match the PyTorch module bit-for-bit-ish; the
    # divide is free at the HBM-writeback roofline.
    denom = jnp.sqrt(sumsq) + 1e-7                            # (1, TN)
    xn = x / denom                                            # (D, TN)

    # out[d, c, n] = xn[d, n] * w[c]: one (C,1)*(1,TN) broadcast multiply per d
    # writes a full, sublane-aligned (C, TN) slab -> unmasked full-vreg stores.
    for d in range(d_dim):
        o_ref[d, :, :] = (w * xn[d:d + 1, :]).astype(o_ref.dtype)


def edge_mapping(edge_vector, weight, *, tile_n=16384, out_dtype=None, layout="ncd"):
    """EdgeMapping forward.

    edge_vector: (N, D) float — N edges, D-dim edge vectors (D small, e.g. 3).
    weight:      (C, 1) float — nn.Linear(1, C, bias=False).weight.
    layout:      "ncd" (default) returns (N, C, D), matching the PyTorch module.
                 "dcn" returns the lane-dense (D, C, N) kernel output with NO
                 extra relayout pass (recommended when the consumer can adapt).
    out_dtype:   e.g. jnp.bfloat16 to halve output writeback bytes.
    """
    N, D = edge_vector.shape
    C = weight.shape[0]
    out_dtype = edge_vector.dtype if out_dtype is None else out_dtype

    # tile_n: multiple of 128 (lane width), clamped so tiny N doesn't over-pad.
    tile_n = max(128, min(_round_up(tile_n, 128), _round_up(N, 128)))
    grid = (pl.cdiv(N, tile_n),)   # ragged tail block is clipped by Pallas

    # N on the lane axis. Input traffic is D/(C*D) of output traffic, so this
    # transpose is cheap; no explicit padding needed anymore.
    x_t = jnp.transpose(edge_vector)                          # (D, N)
    w_col = weight.reshape(C, 1).astype(jnp.float32)          # (C, 1) column

    out_dcn = pl.pallas_call(
        edge_mapping_kernel,
        out_shape=jax.ShapeDtypeStruct((D, C, N), out_dtype),
        grid_spec=pltpu.PrefetchScalarGridSpec(
            num_scalar_prefetch=0,
            grid=grid,
            in_specs=[
                pl.BlockSpec((C, 1), lambda i: (0, 0)),           # weight column
                pl.BlockSpec((D, tile_n), lambda i: (0, i)),      # edge vectors
            ],
            out_specs=pl.BlockSpec((D, C, tile_n), lambda i: (0, 0, i)),
        ),
        compiler_params=pltpu.CompilerParams(
            dimension_semantics=("parallel",),
        ),
    )(w_col, x_t)

    if layout == "dcn":
        return out_dcn                                        # (D, C, N) fast path
    # PyTorch layout; do this relayout once in the consumer if it's in a hot loop.
    return jnp.transpose(out_dcn, (2, 1, 0))                  # (N, C, D)


if __name__ == "__main__":
    key = jax.random.PRNGKey(0)
    k_x, k_w = jax.random.split(key)

    # Small shapes: 200 edges (deliberately NOT a multiple of 128/tile size),
    # 3-D edge vectors, edge_channels = 8.
    N, D, C = 200, 3, 8
    edge_vector = jax.random.normal(k_x, (N, D), dtype=jnp.float32)
    weight = jax.random.normal(k_w, (C, 1), dtype=jnp.float32)   # Linear(1, C).weight

    # Pure-JAX reference (PyTorch semantics).
    xn = edge_vector / (jnp.linalg.norm(edge_vector, axis=1, keepdims=True) + 1e-7)
    ref = xn[:, None, :] * weight[None, :, :]                    # (N, C, D)

    # Default path: PyTorch (N, C, D) layout.
    out = jax.block_until_ready(edge_mapping(edge_vector, weight))
    assert out.shape == (N, C, D), out.shape
    assert jnp.allclose(out, ref, atol=1e-5, rtol=1e-5), float(jnp.max(jnp.abs(out - ref)))

    # Lane-dense fast path: (D, C, N), no wrapper transpose.
    out_dcn = jax.block_until_ready(edge_mapping(edge_vector, weight, layout="dcn"))
    assert out_dcn.shape == (D, C, N), out_dcn.shape
    assert jnp.allclose(jnp.transpose(out_dcn, (2, 1, 0)), ref, atol=1e-5, rtol=1e-5)

    print("KERNEL_OK")
</pallas_src>

<mosaic_0001>
module attributes {stable_mosaic.version = 11 : i64} {
  func.func @edge_mapping_kernel(%arg0: i32, %arg1: memref<8x1xf32, #tpu.memory_space<vmem>>, %arg2: memref<3x256xf32, #tpu.memory_space<vmem>>, %arg3: memref<3x8x256xf32, #tpu.memory_space<vmem>>) attributes {dimension_semantics = [#tpu.dimension_semantics<parallel>], iteration_bounds = array<i64: 1>, scalar_prefetch = 0 : i64, scratch_operands = 0 : i64, tpu.core_type = #tpu.core_type<tc>, window_params = [{pipeline_mode = #tpu.pipeline_mode<synchronous>, transform_indices = @transform_0, window_bounds = array<i64: 8, 1>}, {transform_indices = @transform_1, window_bounds = array<i64: 3, 256>}, {transform_indices = @transform_2, window_bounds = array<i64: 3, 8, 256>}]} {
    %c0 = arith.constant 0 : index
    %c0_0 = arith.constant 0 : index
    %0 = vector.load %arg2[%c0, %c0_0] : memref<3x256xf32, #tpu.memory_space<vmem>>, vector<3x256xf32>
    %c0_1 = arith.constant 0 : index
    %c0_2 = arith.constant 0 : index
    %1 = vector.load %arg1[%c0_1, %c0_2] : memref<8x1xf32, #tpu.memory_space<vmem>>, vector<8x1xf32>
    %2 = vector.extract_strided_slice %0 {offsets = [0, 0], sizes = [1, 256], strides = [1, 1]} : vector<3x256xf32> to vector<1x256xf32>
    %3 = vector.extract_strided_slice %0 {offsets = [0, 0], sizes = [1, 256], strides = [1, 1]} : vector<3x256xf32> to vector<1x256xf32>
    %4 = arith.mulf %2, %3 : vector<1x256xf32>
    %5 = vector.extract_strided_slice %0 {offsets = [1, 0], sizes = [1, 256], strides = [1, 1]} : vector<3x256xf32> to vector<1x256xf32>
    %6 = vector.extract_strided_slice %0 {offsets = [1, 0], sizes = [1, 256], strides = [1, 1]} : vector<3x256xf32> to vector<1x256xf32>
    %7 = arith.mulf %5, %6 : vector<1x256xf32>
    %8 = arith.addf %4, %7 : vector<1x256xf32>
    %9 = vector.extract_strided_slice %0 {offsets = [2, 0], sizes = [1, 256], strides = [1, 1]} : vector<3x256xf32> to vector<1x256xf32>
    %10 = vector.extract_strided_slice %0 {offsets = [2, 0], sizes = [1, 256], strides = [1, 1]} : vector<3x256xf32> to vector<1x256xf32>
    %11 = arith.mulf %9, %10 : vector<1x256xf32>
    %12 = arith.addf %8, %11 : vector<1x256xf32>
    %13 = math.sqrt %12 : vector<1x256xf32>
    %cst = arith.constant 1.000000e-07 : f32
    %14 = vector.broadcast %cst : f32 to vector<1x256xf32>
    %15 = arith.addf %13, %14 : vector<1x256xf32>
    %16 = vector.broadcast %15 : vector<1x256xf32> to vector<3x256xf32>
    %17 = arith.divf %0, %16 : vector<3x256xf32>
    %18 = vector.extract_strided_slice %17 {offsets = [0, 0], sizes = [1, 256], strides = [1, 1]} : vector<3x256xf32> to vector<1x256xf32>
    %19 = vector.broadcast %1 : vector<8x1xf32> to vector<8x256xf32>
    %20 = vector.broadcast %18 : vector<1x256xf32> to vector<8x256xf32>
    %21 = arith.mulf %19, %20 : vector<8x256xf32>
    %c0_3 = arith.constant 0 : index
    %c0_4 = arith.constant 0 : index
    %c0_5 = arith.constant 0 : index
    %22 = vector.load %arg3[%c0_3, %c0_4, %c0_5] : memref<3x8x256xf32, #tpu.memory_space<vmem>>, vector<1x8x256xf32>
    %23 = vector.shape_cast %22 : vector<1x8x256xf32> to vector<8x256xf32>
    %24 = vector.shape_cast %21 : vector<8x256xf32> to vector<1x8x256xf32>
    tpu.vector_store %arg3[%c0_3, %c0_4, %c0_5], %24 {strides = array<i32>} : memref<3x8x256xf32, #tpu.memory_space<vmem>>, vector<1x8x256xf32>,
    %25 = vector.extract_strided_slice %17 {offsets = [1, 0], sizes = [1, 256], strides = [1, 1]} : vector<3x256xf32> to vector<1x256xf32>
    %26 = vector.broadcast %1 : vector<8x1xf32> to vector<8x256xf32>
    %27 = vector.broadcast %25 : vector<1x256xf32> to vector<8x256xf32>
    %28 = arith.mulf %26, %27 : vector<8x256xf32>
    %c1 = arith.constant 1 : index
    %c0_6 = arith.constant 0 : index
    %c0_7 = arith.constant 0 : index
    %29 = vector.load %arg3[%c1, %c0_6, %c0_7] : memref<3x8x256xf32, #tpu.memory_space<vmem>>, vector<1x8x256xf32>
    %30 = vector.shape_cast %29 : vector<1x8x256xf32> to vector<8x256xf32>
    %31 = vector.shape_cast %28 : vector<8x256xf32> to vector<1x8x256xf32>
    tpu.vector_store %arg3[%c1, %c0_6, %c0_7], %31 {strides = array<i32>} : memref<3x8x256xf32, #tpu.memory_space<vmem>>, vector<1x8x256xf32>,
    %32 = vector.extract_strided_slice %17 {offsets = [2, 0], sizes = [1, 256], strides = [1, 1]} : vector<3x256xf32> to vector<1x256xf32>
    %33 = vector.broadcast %1 : vector<8x1xf32> to vector<8x256xf32>
    %34 = vector.broadcast %32 : vector<1x256xf32> to vector<8x256xf32>
    %35 = arith.mulf %33, %34 : vector<8x256xf32>
    %c2 = arith.constant 2 : index
    %c0_8 = arith.constant 0 : index
    %c0_9 = arith.constant 0 : index
    %36 = vector.load %arg3[%c2, %c0_8, %c0_9] : memref<3x8x256xf32, #tpu.memory_space<vmem>>, vector<1x8x256xf32>
    %37 = vector.shape_cast %36 : vector<1x8x256xf32> to vector<8x256xf32>
    %38 = vector.shape_cast %35 : vector<8x256xf32> to vector<1x8x256xf32>
    tpu.vector_store %arg3[%c2, %c0_8, %c0_9], %38 {strides = array<i32>} : memref<3x8x256xf32, #tpu.memory_space<vmem>>, vector<1x8x256xf32>,
    return
  }
  func.func @transform_0(%arg0: i32) -> (i32, i32) {
    %c0_i32 = arith.constant 0 : i32
    %c0_i32_0 = arith.constant 0 : i32
    %c0_i32_1 = arith.constant 0 : i32
    return %c0_i32, %c0_i32_0 : i32, i32
  }
  func.func @transform_1(%arg0: i32) -> (i32, i32) {
    %c0_i32 = arith.constant 0 : i32
    %c0_i32_0 = arith.constant 0 : i32
    return %c0_i32, %arg0 : i32, i32
  }
  func.func @transform_2(%arg0: i32) -> (i32, i32, i32) {
    %c0_i32 = arith.constant 0 : i32
    %c0_i32_0 = arith.constant 0 : i32
    %c0_i32_1 = arith.constant 0 : i32
    return %c0_i32, %c0_i32_0, %arg0 : i32, i32, i32
  }
}

</mosaic_0001>

<bundles_post_ra>
// kernel: tpu_custom_call.1
= control target key start
LH: loop header
LB: loop body
LE: loop exit
PB: predicated region body
PF: predicated region fallthrough
CT: control target
= control target key end

     0   :  { %s208_s0 = inlined_call_operand.vmem [shape: f32[8,1], index: 0, kind: input, shape index: {}]   ;;  %s209_s1 = inlined_call_operand.vmem [shape: f32[3,200], index: 1, kind: input, shape index: {}]   ;;  %s210_s2 = inlined_call_operand.hbm [shape: f32[3,8,200], index: 2, kind: output, shape index: {}]  }
   0x1   :  { %v13_v0 = vld [vmem:[%s208_s0] sm:$0xff] }
   0x2   :  { %7 = vsyncpa [#allocation3], 0  ;;  %v180_v1 = vmov 0   ;;  %v12_v2 = vld [vmem:[%s209_s1] sm:$0x77]  ;;  %v33_v10 = vlaneseq  ;;  %s181_s0 = smov [#allocation2]  }
   0x3   :  { %153 = vset.pattern.permute.xlu0 %v180_v1  ;;  %v14_v3 = vmul.f32 %v12_v2, %v12_v2  ;;  %s136_s1 = sshll.u32 %s181_s0, 4  ;;  %s137_s1 = int_to_ptr.vmem [resolvable:$true] %s136_s1 }
   0x4   :  { %59 = vperm.xlu0 %153, %v13_v0   ;;  %v34_v13 = vshrl.u32 %v33_v10, 7  ;;  %s158_s13 = scalar_lea.vmem %s137_s1, 768  ;;  %p163_p1 = scmp.lt.s32.totalorder %s137_s1, %s137_s1 }
   0x5   :  { %v147_v4 = vrot.slane %v14_v3, 9  ;;  %v148_v6 = vrot.slane %v14_v3, 10  ;;  %p159_p0 = scmp.ne.s32.totalorder %s137_s1, %s158_s13  ;;  %p164_p2 = scmp.lt.s32.totalorder %s158_s13, %s158_s13 }
   0x6   :  { %v35_v15 = vsub.s32 0, %v34_v13  ;;  %v39_v16 = vsub.s32 4, %v34_v13  ;;  %v87_v24 = vsub.s32 1, %v34_v13  ;;  %v91_v25 = vsub.s32 5, %v34_v13 }
   0x7   :  { %v19_v5 = vadd.f32 %v147_v4, %v14_v3  ;;  %v110_v27 = vsub.s32 2, %v34_v13  ;;  %v114_v28 = vsub.s32 6, %v34_v13  ;;  %p165_p3 = por %p164_p2, %p163_p1 }
   0x9   :  { %v23_v7 = vadd.f32 %v148_v6, %v19_v5  ;;  %p166_p4 = pnand %p165_p3, %p159_p0 }
   0xb   :  { %154 = vrsqrt.f32 %v23_v7  ;;  %vm26_vm0 = vcmp.eq.f32.partialorder %v23_v7, inf  ;;  %v29_v11 = vand.u32 2147483648, %v23_v7  ;;  %vm28_vm1 = vcmp.eq.f32.partialorder %v23_v7, 0.0 }
  0x18   :  { %v155_v8 = vpop.eup %154 }
  0x19   :  { %v25_v9 = vmul.f32 %v155_v8, %v23_v7 }
  0x1b   :  { %v27_v12 = vsel %vm26_vm0, %v23_v7, %v25_v9 }
  0x1c   :  { %v30_v14 = vsel %vm28_vm1, %v29_v11, %v27_v12 }
  0x1d   :  { %v31_v17 = vadd.f32 1e-07, %v30_v14 }
  0x1f   :  { %v36_v18 = vrot.slane %v31_v17, %v35_v15  ;;  %v40_v19 = vrot.slane %v31_v17, %v39_v16 }
  0x21   :  { %v46_v20 = vrot.slane %v36_v18, %v35_v15  ;;  %v50_v21 = vrot.slane %v40_v19, %v35_v15 }
  0x23   :  { %v53_v22 = vcombine.low %v46_v20, %v50_v21 }
  0x25   :  { %156 = vrcp.f32 %v53_v22 }
  0x32   :  { %v157_v23 = vpop.eup %156 }
  0x33   :  { %v56_v26 = vmul.f32 %v157_v23, %v12_v2 }
  0x35   :  { %v66_v29 = vrot.slane %v56_v26, %v35_v15  ;;  %v70_v30 = vrot.slane %v56_v26, %v39_v16  ;;  %v88_v31 = vrot.slane %v56_v26, %v87_v24  ;;  %v92_v32 = vrot.slane %v56_v26, %v91_v25 }
  0x36   :  { %v111_v33 = vrot.slane %v56_v26, %v110_v27  ;;  %v115_v34 = vrot.slane %v56_v26, %v114_v28 }
  0x37   :  { %v76_v35 = vrot.slane %v66_v29, %v35_v15  ;;  %v80_v36 = vrot.slane %v70_v30, %v35_v15  ;;  %v98_v37 = vrot.slane %v88_v31, %v87_v24  ;;  %v102_v38 = vrot.slane %v92_v32, %v87_v24 }
  0x38   :  { %v121_v39 = vrot.slane %v111_v33, %v110_v27  ;;  %v125_v40 = vrot.slane %v115_v34, %v110_v27 }
  0x7f   :  { %v60_v41 = vpop.permute.xlu0 %59 }
  0x80   :  { %v81_v42 = vmul.f32 %v76_v35, %v60_v41  ;;  %v82_v43 = vmul.f32 %v80_v36, %v60_v41  ;;  %v103_v44 = vmul.f32 %v98_v37, %v60_v41  ;;  %v104_v45 = vmul.f32 %v102_v38, %v60_v41 }
  0x81   :  { %v126_v46 = vmul.f32 %v121_v39, %v60_v41  ;;  %v127_v47 = vmul.f32 %v125_v40, %v60_v41 }
  0x82   :  { %83 = vst [vmem:[#allocation2] sm:$0xff] %v81_v42  ;;  %84 = vst [vmem:[#allocation2 + $0x8] sm:$0xff] %v82_v43 }
  0x83   :  { %106 = vst [vmem:[#allocation2 + $0x10] sm:$0xff] %v103_v44  ;;  %107 = vst [vmem:[#allocation2 + $0x18] sm:$0xff] %v104_v45 }
  0x84   :  { %129 = vst [vmem:[#allocation2 + $0x20] sm:$0xff] %v126_v46  ;;  %130 = vst [vmem:[#allocation2 + $0x28] sm:$0xff] %v127_v47 }
  0x85   :  { %169 = shalt.err (!%p166_p4)
}
  0x86   :  { %s182_s14 = smov 256   ;;  %s183_s15 = smov 16  }
  0x87   :  { %142 = dma.vmem_to_hbm [thread:$0]  %s137_s1, 768, %s210_s2, [#allocation3], %s182_s14, %s182_s14, %s183_s15  }
  0x88   :  { %178 = dma.done.wait [#allocation3], 768  }
  0x89   :  { %179 = vsyncadd [#allocation3], 4294966528 }
  0x8a   :  { %146 = vsyncpa [#allocation3], 1 }

</bundles_post_ra>
